<compile_context>
chip_gen: v7x
topology: tpu7x:2x2x1
jax: 0.10.0
libtpu: 0.0.40
codegen_flags: <defaults>
</compile_context>

<pallas_src>
import math
import functools

import numpy as np
import jax
import jax.numpy as jnp
from jax import lax
from jax.experimental import pallas as pl
from jax.experimental.pallas import tpu as pltpu


def _round_up(x, m):
    return (x + m - 1) // m * m


# -----------------------------------------------------------------------------
# Kernel 1: value projection  value = x @ Wv + bv  (optionally padding-masked)
# -----------------------------------------------------------------------------
def _value_proj_kernel(has_mask, *refs):
    if has_mask:
        x_ref, nonpad_ref, wv_ref, bv_ref, v_ref = refs
    else:
        x_ref, wv_ref, bv_ref, v_ref = refs
        nonpad_ref = None
    v = jnp.dot(x_ref[...], wv_ref[...],
                preferred_element_type=jnp.float32) + bv_ref[...]
    if nonpad_ref is not None:
        v = v * nonpad_ref[...]                      # zero padded positions
    v_ref[...] = v.astype(v_ref.dtype)


def _value_projection(input_flatten, wv, bv, input_padding_mask,
                      cache_dtype, tile, vmem_limit_bytes):
    N, Lin, C = input_flatten.shape
    TL = _round_up(min(int(tile), _round_up(Lin, 8)), 8)
    Lin_pad = _round_up(Lin, TL)
    has_mask = input_padding_mask is not None

    x = input_flatten.astype(jnp.float32)
    if Lin_pad != Lin:
        x = jnp.pad(x, ((0, 0), (0, Lin_pad - Lin), (0, 0)))

    inputs = [x]
    in_specs = [pl.BlockSpec((None, TL, C), lambda b, t: (b, t, 0))]
    if has_mask:
        nonpad = (1.0 - input_padding_mask.astype(jnp.float32))[..., None]
        if Lin_pad != Lin:
            nonpad = jnp.pad(nonpad, ((0, 0), (0, Lin_pad - Lin), (0, 0)))
        inputs.append(nonpad)
        in_specs.append(pl.BlockSpec((None, TL, 1), lambda b, t: (b, t, 0)))
    inputs += [wv, bv]
    in_specs += [pl.BlockSpec(wv.shape, lambda b, t: (0, 0)),
                 pl.BlockSpec(bv.shape, lambda b, t: (0, 0))]

    return pl.pallas_call(
        functools.partial(_value_proj_kernel, has_mask),
        grid_spec=pltpu.PrefetchScalarGridSpec(
            num_scalar_prefetch=0,
            grid=(N, Lin_pad // TL),
            in_specs=in_specs,
            out_specs=pl.BlockSpec((None, TL, C), lambda b, t: (b, t, 0))),
        out_shape=jax.ShapeDtypeStruct((N, Lin_pad, C), cache_dtype),
        compiler_params=pltpu.CompilerParams(
            dimension_semantics=("parallel", "parallel"),
            vmem_limit_bytes=int(vmem_limit_bytes)),
    )(*inputs)


# -----------------------------------------------------------------------------
# Kernel 2: deformable-attention sampling + output projection per (batch, q-tile)
# -----------------------------------------------------------------------------
def _msda_kernel(spatial_shapes, level_starts, n_heads, n_points, hw_chunk,
                 q_ref, refx_ref, refy_ref, value_ref,
                 wqf_ref, bqf_ref, wout_ref, bout_ref,
                 o_ref, heads_ref):
    TQ, C = q_ref.shape
    L = len(spatial_shapes)
    H = n_heads
    P = n_points
    LP = L * P
    Dh = C // H
    HLP = H * LP

    q = q_ref[...]                                                    # (TQ, C)

    # ---- fused sampling-offset (x, y) + attention-logit projection ---------
    proj = jnp.dot(q, wqf_ref[...],
                   preferred_element_type=jnp.float32) + bqf_ref[...]
    ox = proj[:, 0:HLP]
    oy = proj[:, HLP:2 * HLP]
    logits = proj[:, 2 * HLP:3 * HLP]

    # ---- per-head softmax; 1/denominator folded into the per-head output ---
    lg = logits.reshape(TQ, H, LP)
    lg = lg - jnp.max(lg, axis=-1, keepdims=True)
    ex = jnp.exp(lg)
    denom = jnp.sum(ex, axis=-1)                                      # (TQ, H)
    inv_denom = pl.reciprocal(denom, approx=True)
    attn_un = ex.reshape(TQ, HLP)                 # unnormalized attention

    # ---- vectorized bilinear math for ALL (head, level, point) columns -----
    col = lax.broadcasted_iota(jnp.int32, (1, HLP), 1)
    lvl = (col // P) % L
    wl_i = jnp.zeros((1, HLP), jnp.int32)
    hl_i = jnp.zeros((1, HLP), jnp.int32)
    rx = jnp.zeros((TQ, HLP), jnp.float32)
    ry = jnp.zeros((TQ, HLP), jnp.float32)
    for l, (Hl, Wl) in enumerate(spatial_shapes):
        m = lvl == l
        wl_i = jnp.where(m, Wl, wl_i)
        hl_i = jnp.where(m, Hl, hl_i)
        rx = jnp.where(m, refx_ref[:, l:l + 1], rx)   # ref_x * W_l (pre-scaled)
        ry = jnp.where(m, refy_ref[:, l:l + 1], ry)   # ref_y * H_l (pre-scaled)

    # grid_sample(align_corners=False, zero padding): pixel = loc * size - 0.5
    px = rx + ox - 0.5
    py = ry + oy - 0.5
    x0f = jnp.floor(px)
    y0f = jnp.floor(py)
    fx = px - x0f
    fy = py - y0f
    x0 = x0f.astype(jnp.int32)
    y0 = y0f.astype(jnp.int32)
    x1 = x0 + 1
    y1 = y0 + 1

    vx0 = (x0 >= 0) & (x0 < wl_i)
    vx1 = (x1 >= 0) & (x1 < wl_i)
    vy0 = (y0 >= 0) & (y0 < hl_i)
    vy1 = (y1 >= 0) & (y1 < hl_i)

    x0c = jnp.clip(x0, 0, wl_i - 1)
    x1c = jnp.clip(x1, 0, wl_i - 1)
    y0c = jnp.clip(y0, 0, hl_i - 1)
    y1c = jnp.clip(y1, 0, hl_i - 1)

    w00 = attn_un * (1.0 - fx) * (1.0 - fy) * (vx0 & vy0).astype(jnp.float32)
    w10 = attn_un * fx * (1.0 - fy) * (vx1 & vy0).astype(jnp.float32)
    w01 = attn_un * (1.0 - fx) * fy * (vx0 & vy1).astype(jnp.float32)
    w11 = attn_un * fx * fy * (vx1 & vy1).astype(jnp.float32)

    i00 = y0c * wl_i + x0c          # flat indices local to each level's slab
    i10 = y0c * wl_i + x1c
    i01 = y1c * wl_i + x0c
    i11 = y1c * wl_i + x1c
    corners = ((i00, w00), (i10, w10), (i01, w01), (i11, w11))

    # ---- gather: per-(level, HW-chunk, head) one-hot matmul vs bf16 value --
    head_acc = [jnp.zeros((TQ, Dh), jnp.float32) for _ in range(H)]
    for l, (Hl, Wl) in enumerate(spatial_shapes):
        HW = Hl * Wl
        start = level_starts[l]
        for c0 in range(0, HW, hw_chunk):
            cw = min(hw_chunk, HW - c0)
            iota_c = lax.broadcasted_iota(jnp.int32, (1, cw), 1) + c0
            for h in range(H):
                base_c = h * LP + l * P
                A = jnp.zeros((TQ, cw), jnp.float32)
                for p in range(P):
                    c = base_c + p
                    for idx_all, w_all in corners:
                        A = A + jnp.where(iota_c == idx_all[:, c:c + 1],
                                          w_all[:, c:c + 1], 0.0)
                vslab = value_ref[start + c0:start + c0 + cw,
                                  h * Dh:(h + 1) * Dh]          # (cw, Dh) bf16
                head_acc[h] = head_acc[h] + jnp.dot(
                    A.astype(vslab.dtype), vslab,
                    preferred_element_type=jnp.float32)

    # ---- assemble heads in VMEM scratch, single full-K output projection ---
    for h in range(H):
        heads_ref[:, h * Dh:(h + 1) * Dh] = head_acc[h] * inv_denom[:, h:h + 1]

    out = jnp.dot(heads_ref[...], wout_ref[...],
                  preferred_element_type=jnp.float32) + bout_ref[...]
    o_ref[...] = out.astype(o_ref.dtype)


# -----------------------------------------------------------------------------
# Wrapper
# -----------------------------------------------------------------------------
def ms_deform_attn_forward(query, reference_points, input_flatten,
                           spatial_shapes, level_start_index, params,
                           n_heads, n_points, input_padding_mask=None,
                           q_tile=128, value_tile=512, hw_chunk=1024,
                           cache_dtype=jnp.bfloat16,
                           vmem_limit_bytes=64 * 1024 * 1024):
    """spatial_shapes / level_start_index are static python sequences of ints."""
    N, Lq, C = query.shape
    Lin = input_flatten.shape[1]
    L = len(spatial_shapes)
    H, P = n_heads, n_points
    HLP = H * L * P
    assert sum(int(h) * int(w) for h, w in spatial_shapes) == Lin
    assert C % H == 0

    if reference_points.shape[-1] != 2:
        # TODO(synk): reference boxes (last dim == 4) variant not implemented.
        raise NotImplementedError("only reference_points[..., :2] variant supported")

    wv, bv, wo, bo, wa, ba, wout, bout = params

    # ---- kernel 1: bf16 value cache (padding mask applied inside) ----------
    value = _value_projection(input_flatten, wv, bv, input_padding_mask,
                              cache_dtype, value_tile, vmem_limit_bytes)
    Lin_pad = value.shape[1]

    # ---- query-side preprocessing (pad Lq so TQ is a multiple of 8) --------
    TQ = _round_up(min(int(q_tile), _round_up(Lq, 8)), 8)
    Lq_pad = _round_up(Lq, TQ)
    num_qt = Lq_pad // TQ

    # pre-scale reference points to pixel units: (ref_x * W_l, ref_y * H_l)
    norm = jnp.array([[float(w), float(h)] for (h, w) in spatial_shapes],
                     jnp.float32)                                  # (L, 2) = (W, H)
    ref_scaled = reference_points.astype(jnp.float32) * norm[None, None, :, :]
    refx = ref_scaled[..., 0]                                      # (N, Lq, L)
    refy = ref_scaled[..., 1]
    q = query.astype(jnp.float32)
    if Lq_pad != Lq:
        pad = ((0, 0), (0, Lq_pad - Lq), (0, 0))
        q = jnp.pad(q, pad)
        refx = jnp.pad(refx, pad)
        refy = jnp.pad(refy, pad)

    # fuse sampling-offset (x / y) and attention-logit projections -> (C, 3*HLP)
    wox, woy = wo[:, 0::2], wo[:, 1::2]
    box, boy = bo[:, 0::2], bo[:, 1::2]
    wqf = jnp.concatenate([wox, woy, wa], axis=1)
    bqf = jnp.concatenate([box, boy, ba], axis=1)

    hw_chunk = max(128, (int(hw_chunk) // 128) * 128)   # lane-aligned chunks

    inputs = [q, refx, refy, value, wqf, bqf, wout, bout]
    in_specs = [
        pl.BlockSpec((None, TQ, C), lambda b, t: (b, t, 0)),       # query tile
        pl.BlockSpec((None, TQ, L), lambda b, t: (b, t, 0)),       # ref_x * W_l
        pl.BlockSpec((None, TQ, L), lambda b, t: (b, t, 0)),       # ref_y * H_l
        # bf16 value cache: constant along the q-tile axis -> not re-DMA'd.
        pl.BlockSpec((None, Lin_pad, C), lambda b, t: (b, 0, 0)),
        pl.BlockSpec(wqf.shape, lambda b, t: (0, 0)),
        pl.BlockSpec(bqf.shape, lambda b, t: (0, 0)),
        pl.BlockSpec(wout.shape, lambda b, t: (0, 0)),
        pl.BlockSpec(bout.shape, lambda b, t: (0, 0)),
    ]

    kern = functools.partial(
        _msda_kernel,
        tuple((int(h), int(w)) for h, w in spatial_shapes),
        tuple(int(s) for s in level_start_index),
        H, P, hw_chunk)

    grid_spec = pltpu.PrefetchScalarGridSpec(
        num_scalar_prefetch=0,
        grid=(N, num_qt),
        in_specs=in_specs,
        out_specs=pl.BlockSpec((None, TQ, C), lambda b, t: (b, t, 0)),
        scratch_shapes=[pltpu.VMEM((TQ, C), jnp.float32)])   # per-head assembly

    cost = pl.CostEstimate(
        flops=int(2 * N * Lq_pad * C * (3 * HLP)     # fused offset/logit proj
                  + 2 * N * Lq_pad * Lin * C         # one-hot gather matmuls
                  + 2 * N * Lq_pad * C * C),         # output projection
        transcendentals=int(N * Lq_pad * (HLP + H)),
        bytes_accessed=int(4 * N * Lq_pad * (2 * C + 2 * L)
                           + 2 * N * Lin_pad * C
                           + 4 * (wqf.size + bqf.size + wout.size + bout.size)),
    )

    out = pl.pallas_call(
        kern,
        grid_spec=grid_spec,
        out_shape=jax.ShapeDtypeStruct((N, Lq_pad, C), jnp.float32),
        compiler_params=pltpu.CompilerParams(
            dimension_semantics=("parallel", "parallel"),
            vmem_limit_bytes=int(vmem_limit_bytes)),
        cost_estimate=cost,
    )(*inputs)
    return out[:, :Lq, :]


# -----------------------------------------------------------------------------
# Deterministic parameter init (mirrors MSDeformAttn._reset_parameters)
# weights are stored as (in, out); biases as (1, out)
# -----------------------------------------------------------------------------
def init_params(key, d_model, n_heads, n_levels, n_points):
    C = d_model
    hlp = n_heads * n_levels * n_points

    # sampling_offsets: weight = 0, bias = grid_init
    wo = jnp.zeros((C, hlp * 2), jnp.float32)
    thetas = jnp.arange(n_heads, dtype=jnp.float32) * (2.0 * math.pi / n_heads)
    grid = jnp.stack([jnp.cos(thetas), jnp.sin(thetas)], axis=-1)         # (H, 2)
    grid = grid / jnp.max(jnp.abs(grid), axis=-1, keepdims=True)
    grid = jnp.tile(grid[:, None, None, :], (1, n_levels, n_points, 1))   # (H, L, P, 2)
    grid = grid * jnp.arange(1, n_points + 1, dtype=jnp.float32)[None, None, :, None]
    bo = grid.reshape(1, hlp * 2)

    # attention_weights: weight = 0, bias = 0
    wa = jnp.zeros((C, hlp), jnp.float32)
    ba = jnp.zeros((1, hlp), jnp.float32)

    # value_proj / output_proj: xavier_uniform weights, zero bias
    k1, k2 = jax.random.split(key)
    bound = math.sqrt(6.0 / (C + C))
    wv = jax.random.uniform(k1, (C, C), jnp.float32, -bound, bound)
    bv = jnp.zeros((1, C), jnp.float32)
    wout = jax.random.uniform(k2, (C, C), jnp.float32, -bound, bound)
    bout = jnp.zeros((1, C), jnp.float32)

    return (wv, bv, wo, bo, wa, ba, wout, bout)


# -----------------------------------------------------------------------------
# Pure-JAX reference (for correctness check)
# -----------------------------------------------------------------------------
def ref_forward(query, reference_points, input_flatten, spatial_shapes,
                level_start_index, params, n_heads, n_points,
                input_padding_mask=None):
    wv, bv, wo, bo, wa, ba, wout, bout = params
    N, Lq, C = query.shape
    L = len(spatial_shapes)
    Hh, P = n_heads, n_points
    Dh = C // Hh

    value = input_flatten @ wv + bv[0]
    if input_padding_mask is not None:
        value = jnp.where(input_padding_mask[..., None], 0.0, value)
    Lin = value.shape[1]
    value = value.reshape(N, Lin, Hh, Dh)

    offs = (query @ wo + bo[0]).reshape(N, Lq, Hh, L, P, 2)
    attn = (query @ wa + ba[0]).reshape(N, Lq, Hh, L * P)
    attn = jax.nn.softmax(attn, axis=-1).reshape(N, Lq, Hh, L, P)

    normalizer = jnp.array([[w, h] for (h, w) in spatial_shapes], jnp.float32)
    loc = reference_points[:, :, None, :, None, :] + \
        offs / normalizer[None, None, None, :, None, :]          # (N,Lq,H,L,P,2)

    out = jnp.zeros((N, Lq, Hh, Dh), jnp.float32)
    for l, (Hl, Wl) in enumerate(spatial_shapes):
        start = level_start_index[l]
        v_l = value[:, start:start + Hl * Wl].reshape(N, Hl, Wl, Hh, Dh)
        px = loc[:, :, :, l, :, 0] * Wl - 0.5                    # (N, Lq, H, P)
        py = loc[:, :, :, l, :, 1] * Hl - 0.5
        x0 = jnp.floor(px)
        y0 = jnp.floor(py)
        for dx, dy in ((0, 0), (1, 0), (0, 1), (1, 1)):
            xi = x0 + dx
            yi = y0 + dy
            wgt = (1.0 - jnp.abs(px - xi)) * (1.0 - jnp.abs(py - yi))
            valid = (xi >= 0) & (xi < Wl) & (yi >= 0) & (yi < Hl)
            xc = jnp.clip(xi, 0, Wl - 1).astype(jnp.int32)
            yc = jnp.clip(yi, 0, Hl - 1).astype(jnp.int32)
            samp = v_l[jnp.arange(N)[:, None, None, None],
                       yc, xc,
                       jnp.arange(Hh)[None, None, :, None]]      # (N,Lq,H,P,Dh)
            w = attn[:, :, :, l, :] * wgt * valid.astype(jnp.float32)
            out = out + jnp.sum(w[..., None] * samp, axis=3)

    out = out.reshape(N, Lq, C)
    return out @ wout + bout[0]


# -----------------------------------------------------------------------------
if __name__ == "__main__":
    # small shapes: d_model=32, n_heads=8 (d_head=4), n_levels=1, n_points=8
    N, Lq, C = 2, 8, 32
    N_HEADS, N_LEVELS, N_POINTS = 8, 1, 8
    spatial_shapes = ((8, 8),)          # [(H_0, W_0)]
    level_start_index = (0,)
    Lin = sum(h * w for h, w in spatial_shapes)

    key = jax.random.PRNGKey(0)
    k1, k2, k3, k4 = jax.random.split(key, 4)
    query = jax.random.normal(k1, (N, Lq, C), jnp.float32)
    input_flatten = jax.random.normal(k2, (N, Lin, C), jnp.float32)
    reference_points = jax.random.uniform(k3, (N, Lq, N_LEVELS, 2), jnp.float32)
    params = init_params(k4, C, N_HEADS, N_LEVELS, N_POINTS)

    out = ms_deform_attn_forward(query, reference_points, input_flatten,
                                 spatial_shapes, level_start_index, params,
                                 N_HEADS, N_POINTS, input_padding_mask=None)
    out = jax.block_until_ready(out)

    with jax.default_matmul_precision("highest"):
        ref = ref_forward(query, reference_points, input_flatten,
                          spatial_shapes, level_start_index, params,
                          N_HEADS, N_POINTS, input_padding_mask=None)
    ref = jax.block_until_ready(ref)

    # tolerance accounts for the bf16 value cache / bf16 one-hot gather matmuls
    np.testing.assert_allclose(np.asarray(out), np.asarray(ref),
                               rtol=1e-2, atol=1e-2)
    print("KERNEL_OK")
</pallas_src>

<mosaic_0001>
module attributes {stable_mosaic.version = 11 : i64} {
  func.func @_value_proj_kernel(%arg0: i32, %arg1: i32, %arg2: memref<1x64x32xf32, #tpu.memory_space<vmem>>, %arg3: memref<32x32xf32, #tpu.memory_space<vmem>>, %arg4: memref<1x32xf32, #tpu.memory_space<vmem>>, %arg5: memref<1x64x32xbf16, #tpu.memory_space<vmem>>) attributes {dimension_semantics = [#tpu.dimension_semantics<parallel>, #tpu.dimension_semantics<parallel>], iteration_bounds = array<i64: 2, 1>, scalar_prefetch = 0 : i64, scratch_operands = 0 : i64, tpu.core_type = #tpu.core_type<tc>, window_params = [{transform_indices = @transform_0, window_bounds = array<i64: 1, 64, 32>}, {pipeline_mode = #tpu.pipeline_mode<synchronous>, transform_indices = @transform_1, window_bounds = array<i64: 32, 32>}, {pipeline_mode = #tpu.pipeline_mode<synchronous>, transform_indices = @transform_2, window_bounds = array<i64: 1, 32>}, {transform_indices = @transform_3, window_bounds = array<i64: 1, 64, 32>}]} {
    %c0 = arith.constant 0 : index
    %c0_0 = arith.constant 0 : index
    %c0_1 = arith.constant 0 : index
    %0 = vector.load %arg2[%c0, %c0_0, %c0_1] : memref<1x64x32xf32, #tpu.memory_space<vmem>>, vector<1x64x32xf32>
    %1 = vector.shape_cast %0 : vector<1x64x32xf32> to vector<64x32xf32>
    %c0_2 = arith.constant 0 : index
    %c0_3 = arith.constant 0 : index
    %2 = vector.load %arg3[%c0_2, %c0_3] : memref<32x32xf32, #tpu.memory_space<vmem>>, vector<32x32xf32>
    %cst = arith.constant dense<0.000000e+00> : vector<64x32xf32>
    %3 = tpu.matmul %1, %2, %cst {dimension_numbers = #tpu.dot_dimension_numbers<[1], [0], [0], [1], [0, 0, 1, 1], [], []>} : vector<64x32xf32>, vector<32x32xf32>, vector<64x32xf32> -> vector<64x32xf32>
    %c0_4 = arith.constant 0 : index
    %c0_5 = arith.constant 0 : index
    %4 = vector.load %arg4[%c0_4, %c0_5] : memref<1x32xf32, #tpu.memory_space<vmem>>, vector<1x32xf32>
    %5 = vector.broadcast %4 : vector<1x32xf32> to vector<64x32xf32>
    %6 = arith.addf %3, %5 : vector<64x32xf32>
    %7 = arith.truncf %6 : vector<64x32xf32> to vector<64x32xbf16>
    %c0_6 = arith.constant 0 : index
    %c0_7 = arith.constant 0 : index
    %c0_8 = arith.constant 0 : index
    %8 = vector.load %arg5[%c0_6, %c0_7, %c0_8] : memref<1x64x32xbf16, #tpu.memory_space<vmem>>, vector<1x64x32xbf16>
    %9 = vector.shape_cast %8 : vector<1x64x32xbf16> to vector<64x32xbf16>
    %10 = vector.shape_cast %7 : vector<64x32xbf16> to vector<1x64x32xbf16>
    tpu.vector_store %arg5[%c0_6, %c0_7, %c0_8], %10 {strides = array<i32>} : memref<1x64x32xbf16, #tpu.memory_space<vmem>>, vector<1x64x32xbf16>,
    return
  }
  func.func @transform_0(%arg0: i32, %arg1: i32) -> (i32, i32, i32) {
    %c0_i32 = arith.constant 0 : i32
    %c0_i32_0 = arith.constant 0 : i32
    return %arg0, %arg1, %c0_i32 : i32, i32, i32
  }
  func.func @transform_1(%arg0: i32, %arg1: i32) -> (i32, i32) {
    %c0_i32 = arith.constant 0 : i32
    %c0_i32_0 = arith.constant 0 : i32
    %c0_i32_1 = arith.constant 0 : i32
    return %c0_i32, %c0_i32_0 : i32, i32
  }
  func.func @transform_2(%arg0: i32, %arg1: i32) -> (i32, i32) {
    %c0_i32 = arith.constant 0 : i32
    %c0_i32_0 = arith.constant 0 : i32
    %c0_i32_1 = arith.constant 0 : i32
    return %c0_i32, %c0_i32_0 : i32, i32
  }
  func.func @transform_3(%arg0: i32, %arg1: i32) -> (i32, i32, i32) {
    %c0_i32 = arith.constant 0 : i32
    %c0_i32_0 = arith.constant 0 : i32
    return %arg0, %arg1, %c0_i32 : i32, i32, i32
  }
}

</mosaic_0001>

<bundles_post_ra>
// kernel: tpu_custom_call.1
= control target key start
LH: loop header
LB: loop body
LE: loop exit
PB: predicated region body
PF: predicated region fallthrough
CT: control target
= control target key end

     0   :  { %8 = vsyncpa [#allocation3], 0  ;;  %s1216_s0 = inlined_call_operand.hbm [shape: f32[2,64,32], index: 0, kind: input, shape index: {}]   ;;  %s1217_s1 = inlined_call_operand.hbm [shape: f32[32,32], index: 1, kind: input, shape index: {}]   ;;  %s1218_s2 = inlined_call_operand.hbm [shape: f32[1,32], index: 2, kind: input, shape index: {}]   ;;  %s1219_s3 = inlined_call_operand.hbm [shape: bf16[2,64,32], index: 3, kind: output, shape index: {}]  }
   0x1   :  { %10 = vsyncpa [#allocation3 + $0x1], 0 }
   0x2   :  { %11 = vsyncpa [#allocation6], 0 }
   0x3   :  { %12 = vsyncpa [#allocation4], 0 }
   0x4   :  { %14 = vsyncpa [#allocation4 + $0x1], 0  ;;  %s927_s12 = smov 0   ;;  %s929_s13 = smov 0  }
   0x5   :  { %s931_s14 = smov 0   ;;  %s933_s15 = smov 0  }
   0x6   :  { %s935_s16 = smov 0   ;;  %s937_s17 = smov 0  }
   0x7 LB: > { %s548_s18 = sadd.s32 4294967295, %s897_s17   ;;  %s549_s19 = sadd.s32 4294967294, %s897_s17   ;;  %s897_s17 = sphi %s937_s17, %s20_s17   ;;  %s893_s16 = sphi %s935_s16, %s1241_s16   ;;  %s889_s15 = sphi %s933_s15, %s1240_s15   ;;  %s885_s14 = sphi %s931_s14, %s1239_s14   ;;  %s881_s13 = sphi %s929_s13, %s1238_s13   ;;  %s877_s12 = sphi %s927_s12, %s1237_s12  }
   0x8   : > { %p54_p0 = scmp.ne.s32.totalorder %s881_s13, %s877_s12  ;;  %p961_p1 = scmp.eq.s32.totalorder %s548_s18, 0 }
   0x9   : > { %p965_p2 = scmp.eq.s32.totalorder %s548_s18, 1  ;;  %p128_p3 = scmp.eq.s32.totalorder %s549_s19, 1 }
   0xa   : > { %s1224_s20 = scalar_select %p961_p1, 1, 0 }
   0xb   : > { %p971_p4 = por %p961_p1, %p54_p0  ;;  %p550_p5 = scmp.ge.s32.totalorder %s897_s17, 1 }
   0xc   : > { %p976_p6 = por %p128_p3, %p54_p0  ;;  %p135_p7 = scmp.lt.s32.totalorder %s897_s17, 3 }
   0xd   : > { %s1226_s22 = scalar_select %p971_p4, 1, 0 }
   0xe   : > { %s1227_s23 = scalar_select %p976_p6, 1, 0 }
   0xf   : > { %p981_p8 = pnand %p550_p5, %p135_p7  ;;  %s899_s25 = smov [#allocation5]  }
  0x10   : > { %s147_s26 = sshll.u32 %s899_s25, 4  ;;  %s900_s28 = smov [#allocation7]   ;;  %s985_s26 = int_to_ptr.vmem [resolvable:$true] %s147_s26 }
  0x11   : > { %p650_p9 = pneg %p981_p8  ;;  %s161_s29 = sshll.u32 %s900_s28, 4  ;;  %s996_s29 = int_to_ptr.vmem [resolvable:$true] %s161_s29 }
  0x12   : > { %s725_s5 = scalar_lea.hbm %s1217_s1, 512 }
  0x13   : > { %p992_p11 = pnand %p650_p9, %p961_p1  ;;  %p726_p12 = scmp.ne.s32.totalorder %s1217_s1, %s725_s5 }
  0x14   : > { %p732_p5 = scmp.lt.u32.totalorder %s725_s5, %s1217_s1 }
  0x15   : > { %p727_p13 = pneg %p992_p11 }
  0x17   : > { %p728_p0 = pnand %p727_p13, %p726_p12 }
  0x19   : > { %p729_p3 = pneg %p728_p0 }
  0x1b   : > { %p734_p7 = pnand %p732_p5, %p729_p3 }
  0x1d   : > { %737 = shalt.err (!%p734_p7)
}
  0x1e   : > { %s738_s10 = scalar_lea.vmem %s985_s26, 512  ;;  %p746_p1 = scmp.lt.s32.totalorder %s985_s26, %s985_s26 }
  0x1f   : > { %p739_p9 = scmp.ne.s32.totalorder %s985_s26, %s738_s10  ;;  %p747_p12 = scmp.lt.s32.totalorder %s738_s10, %s738_s10 }
  0x21   : > { %p741_p10 = pnand %p739_p9, %p727_p13  ;;  %p748_p0 = por %p747_p12, %p746_p1 }
  0x23   : > { %p742_p6 = pneg %p741_p10 }
  0x25   : > { %p749_p4 = pnand %p748_p0, %p742_p6 }
  0x27   : > { %752 = shalt.err (!%p749_p4)
}
  0x28   : > { %s901_s11 = smov 128   ;;  %s902_s18 = smov 8  }
  0x29   : > { %653 = dma.hbm_to_vmem [thread:$0]  (!%p992_p11), %s1217_s1, 512, %s985_s26, [#allocation6], %s901_s11, %s901_s11, %s902_s18  }
  0x2a   : > { %s753_s4 = scalar_lea.hbm %s1218_s2, 16 }
  0x2b   : > { %p754_p1 = scmp.ne.s32.totalorder %s1218_s2, %s753_s4  ;;  %p760_p10 = scmp.lt.u32.totalorder %s753_s4, %s1218_s2 }
  0x2d   : > { %p756_p4 = pnand %p754_p1, %p727_p13 }
  0x2f   : > { %p757_p6 = pneg %p756_p4 }
  0x31   : > { %p762_p3 = pnand %p760_p10, %p757_p6 }
  0x33   : > { %765 = shalt.err (!%p762_p3)
}
  0x34   : > { %s766_s26 = scalar_lea.vmem %s996_s29, 16  ;;  %s773_s9 = scalar_lea.vmem %s996_s29, 32 }
  0x35   : > { %p767_p5 = scmp.ne.s32.totalorder %s996_s29, %s766_s26  ;;  %p774_p12 = scmp.lt.s32.totalorder %s996_s29, %s996_s29 }
  0x36   : > { %p775_p0 = scmp.lt.s32.totalorder %s773_s9, %s766_s26 }
  0x37   : > { %p769_p7 = pnand %p767_p5, %p727_p13 }
  0x38   : > { %p776_p1 = por %p775_p0, %p774_p12 }
  0x39   : > { %p770_p9 = pneg %p769_p7 }
  0x3b   : > { %p777_p4 = pnand %p776_p1, %p770_p9 }
  0x3d   : > { %780 = shalt.err (!%p777_p4)
}
  0x3e   : > { %656 = dma.hbm_to_vmem [thread:$0]  (!%p992_p11), %s1218_s2, 16, %s996_s29, [#allocation6]  }
  0x3f   : > { %s32_s25 = sadd.s32 1, %s893_s16  ;;  %s41_s28 = sadd.s32 1, %s885_s14 }
  0x40   : > { %p34_p13 = scmp.ge.s32.totalorder %s32_s25, 2  ;;  %p48_p6 = scmp.ne.s32.totalorder %s885_s14, %s881_s13 }
  0x41   : > { %p49_p10 = scmp.eq.s32.totalorder %s897_s17, 0  ;;  %p667_p3 = scmp.lt.s32.totalorder %s897_s17, 2 }
  0x42   : > { %s1243_s25 = smov (%p34_p13, %s32_s25), 0  ;;  %p1064_p7 = por %p965_p2, %p48_p6 }
  0x43   : > { %p50_p5 = por %p49_p10, %p48_p6  ;;  %s36_s30 = ssub.s32 %s893_s16, %s1243_s25 }
  0x44   : > { %s1230_s27 = scalar_select %p1064_p7, 1, 0 }
  0x45   : > { %s172_s4 = sand.u32 1, %s885_s14   ;;  %p39_p9 = scmp.eq.s32.totalorder %s36_s30, 0 }
  0x46   : > { %s554_s29 = sshll.u32 %s172_s4, 6  ;;  %s584_s5 = sshll.u32 %s893_s16, 10 }
  0x47   : > { %s1073_s6 = scalar_select %p39_p9, %s885_s14, %s41_s28  }
  0x48   : > { %s1078_s26 = scalar_lea.hbm %s1216_s0, %s584_s5  ;;  %s176_s21 = scalar_lea.vmem [#allocation2], %s554_s29 }
  0x49   : > { %s185_s9 = sshll.u32 %s176_s21, 4  ;;  %p1082_p2 = pnand %p667_p3, %p50_p5  ;;  %s1086_s9 = int_to_ptr.vmem [resolvable:$true] %s185_s9 }
  0x4a   : > { %s1088_s19 = scalar_lea.sflag [#allocation3], %s172_s4  ;;  %s781_s28 = scalar_lea.hbm %s1078_s26, 1024 }
  0x4b   : > { %p782_p11 = scmp.ne.s32.totalorder %s1078_s26, %s781_s28  ;;  %p783_p12 = pneg %p1082_p2 }
  0x4c   : > { %s786_s5 = scalar_lea.hbm %s1216_s0, 2048  ;;  %p787_p4 = scmp.lt.u32.totalorder %s1078_s26, %s1216_s0 }
  0x4d   : > { %p784_p0 = pnand %p783_p12, %p782_p11  ;;  %p788_p13 = scmp.lt.u32.totalorder %s786_s5, %s781_s28 }
  0x4e   : > { %p790_p10 = scmp.lt.u32.totalorder %s781_s28, %s1078_s26 }
  0x4f   : > { %p785_p1 = pneg %p784_p0  ;;  %p789_p6 = por %p788_p13, %p787_p4 }
  0x51   : > { %p791_p3 = por %p790_p10, %p789_p6 }
  0x53   : > { %p792_p5 = pnand %p791_p3, %p785_p1 }
  0x55   : > { %795 = shalt.err (!%p792_p5)
}
  0x56   : > { %s796_s4 = scalar_lea.vmem %s1086_s9, 1024  ;;  %s903_s21 = smov [#allocation2]  }
  0x57   : > { %p797_p9 = scmp.ne.s32.totalorder %s1086_s9, %s796_s4  ;;  %s801_s30 = sshll.u32 %s903_s21, 4  ;;  %s802_s30 = int_to_ptr.vmem [resolvable:$false] %s801_s30 }
  0x58   : > { %s803_s29 = scalar_lea.vmem %s802_s30, 2048  ;;  %p804_p7 = scmp.lt.s32.totalorder %s1086_s9, %s802_s30 }
  0x59   : > { %p799_p11 = pnand %p797_p9, %p783_p12  ;;  %p805_p4 = scmp.lt.s32.totalorder %s803_s29, %s796_s4 }
  0x5b   : > { %p800_p0 = pneg %p799_p11  ;;  %p806_p13 = por %p805_p4, %p804_p7 }
  0x5d   : > { %p807_p6 = pnand %p806_p13, %p800_p0 }
  0x5f   : > { %810 = shalt.err (!%p807_p6)
}
  0x60   : > { %660 = dma.hbm_to_vmem [thread:$0]  (!%p1082_p2), %s1078_s26, 1024, %s1086_s9, %s1088_s19, %s901_s11, %s901_s11, %s902_s18  }
  0x61   : > { %197 = sbr.rel (%p981_p8) target bundleno = 356 (0x164), region = 32  ;;  %s1122_s28 = sand.u32 (!%p981_p8), 1, %s881_s13  }
  0x62   : > { %s558_s5 = sshll.u32 (!%p981_p8), %s1122_s28, 6  ;;  %s200_s7 = scalar_lea.sflag (!%p981_p8), [#allocation3], %s1122_s28 }
  0x63   : > { %s1126_s8 = scalar_lea.vmem (!%p981_p8), [#allocation2], %s558_s5  ;;  %p1232_p7 = scmp.ne.s32.totalorder (!%p981_p8), %s1226_s22, 0 }
  0x68   : > { %864 = dma.done.wait (%p1232_p7), %s200_s7, 1024  }
  0x69   : > { %866 = vsyncadd (%p1232_p7), %s200_s7, 4294966272  ;;  %p1233_p2 = scmp.ne.s32.totalorder %s1224_s20, 0 }
  0x6b   : > { %868 = dma.done.wait (%p1233_p2), [#allocation6], 528  }
  0x6c   : > { %870 = vsyncadd (%p1233_p2), [#allocation6], 4294966768  ;;  %vm255_vm0 = vcmask 261120   ;;  %v244_v0 = vld [vmem:[#allocation5] sm:$0xff]  ;;  %v245_v1 = vld [vmem:[#allocation5 + $0x8] sm:$0xff]  ;;  %s561_s20 = sshll.u32 %s1122_s28, 5 }
  0x6d   : > { %v246_v2 = vld [vmem:[#allocation5 + $0x10] sm:$0xff]  ;;  %v626_v3 = vpack.c.bf16 %v245_v1, %v244_v0  ;;  %v247_v4 = vld [vmem:[#allocation5 + $0x18] sm:$0xff]  ;;  %v236_v5 = vld [vmem:[%s1126_s8] sm:$0xff]  ;;  %vm417_vm1 = vcmask 257024   ;;  %s593_s22 = sshll.u32 %s889_s15, 9  ;;  %s233_s24 = scalar_lea.vmem [#allocation8], %s561_s20 }
  0x6e   : > { %v240_v6 = vld [vmem:[%s1126_s8 + $0x20] sm:$0xff]  ;;  %v630_v7 = vpack.c.bf16 %v247_v4, %v246_v2  ;;  %614 = vmatprep.mubr.msk.f32.mxu0 %vm255_vm0, %v236_v5  ;;  %v237_v8 = vld [vmem:[%s1126_s8 + $0x8] sm:$0xff]  ;;  %v238_v10 = vld [vmem:[%s1126_s8 + $0x10] sm:$0xff]  ;;  %s442_s11 = sshll.u32 %s233_s24, 4  ;;  %s1161_s26 = scalar_lea.hbm %s1219_s3, %s593_s22  ;;  %s1163_s11 = int_to_ptr.vmem [resolvable:$true] %s442_s11 }
  0x6f   : > { %620 = vmatprep.mubr.msk.f32.mxu1 %vm255_vm0, %v240_v6  ;;  %627 = vmatprep.subr.bf16.mxu0 %v626_v3  ;;  %v241_v9 = vld [vmem:[%s1126_s8 + $0x28] sm:$0xff]  ;;  %v242_v11 = vld [vmem:[%s1126_s8 + $0x30] sm:$0xff]  ;;  %v239_v12 = vld [vmem:[%s1126_s8 + $0x18] sm:$0xff]  ;;  %s427_s9 = scalar_lea.sflag [#allocation4], %s1122_s28  ;;  %s811_s10 = scalar_lea.vmem %s1163_s11, 512 }
  0x70   : > { %634 = vmatprep.subr.bf16.mxu1 %v626_v3  ;;  %629 = vmatpush3.bf16.msra.mxu0 %v626_v3  ;;  %v243_v13 = vld [vmem:[%s1126_s8 + $0x38] sm:$0xff]  ;;  %v562_v14 = vld [vmem:[#allocation7] ss:$0 sm:$0xff]  ;;  %p812_p8 = scmp.ne.s32.totalorder %s1163_s11, %s811_s10  ;;  %p1234_p12 = scmp.ne.s32.totalorder %s1230_s27, 0 }
  0x71   : > { %636 = vmatpush3.bf16.msra.mxu1 %v626_v3  ;;  %631 = vmatprep.subr.bf16.mxu0 %v630_v7  ;;  %s904_s19 = smov [#allocation8]  }
  0x72   : > { %635 = vmatprep.subr.bf16.mxu1 %v630_v7  ;;  %p813_p1 = pnand %p812_p8, %p1234_p12  ;;  %s815_s4 = sshll.u32 %s904_s19, 4  ;;  %s816_s4 = int_to_ptr.vmem [resolvable:$false] %s815_s4 }
  0x73   : > { %s817_s21 = scalar_lea.vmem %s816_s4, 1024  ;;  %p818_p3 = scmp.lt.s32.totalorder %s1163_s11, %s816_s4 }
  0x74   : > { %633 = vmatpush3.bf16.msra.mxu0 %v630_v7  ;;  %p814_p10 = pneg %p813_p1  ;;  %p819_p5 = scmp.lt.s32.totalorder %s817_s21, %s811_s10 }
  0x75   : > { %637 = vmatpush3.bf16.msra.mxu1 %v630_v7 }
  0x76   : > { %p820_p9 = por %p819_p5, %p818_p3 }
  0x77   : > { %615 = vmatmul.mubr.msk.f32.vlgmr.msra.gmra.mrb[0].mxu0 %vm255_vm0, %v237_v8 }
  0x78   : > { %621 = vmatmul.mubr.msk.f32.vlgmr.msra.gmra.mrb[0].mxu1 %vm255_vm0, %v241_v9  ;;  %617 = vmatprep.mubr.msk.f32.mxu0 %vm255_vm0, %v238_v10  ;;  %p821_p11 = pnand %p820_p9, %p814_p10 }
  0x79   : > { %623 = vmatprep.mubr.msk.f32.mxu1 %vm255_vm0, %v242_v11 }
  0x7b   : > { %618 = vmatmul.mubr.msk.f32.gmra.mrb[2].mxu0 %vm255_vm0, %v239_v12 }
  0x7c   : > { %624 = vmatmul.mubr.msk.f32.gmra.mrb[2].mxu1 %vm255_vm0, %v243_v13 }
 0x14a   : > { %v616_v15 = vpop.f32.mrb[0].mxu0 }
 0x14b   : > { %v622_v16 = vpop.f32.mrb[0].mxu1  ;;  %v352_v17 = vadd.f32 %v616_v15, %v562_v14  ;;  %v346_v19 = vpop.f32.mrb[1].mxu0 }
 0x14c   : > { %v372_v18 = vadd.f32 %v622_v16, %v562_v14  ;;  %v366_v20 = vpop.f32.mrb[1].mxu1  ;;  %v347_v21 = vadd.f32 %v562_v14, %v346_v19 }
 0x14d   : > { %v367_v22 = vadd.f32 %v562_v14, %v366_v20  ;;  %v586_v23 = vpack.c.bf16 %v352_v17, %v352_v17 }
 0x14e   : > { %v590_v24 = vpack.c.bf16 %v372_v18, %v372_v18  ;;  %v585_v25 = vpack.c.bf16 %v347_v21, %v347_v21  ;;  %v619_v27 = vpop.f32.mrb[2].mxu0 }
 0x14f   : > { %v589_v26 = vpack.c.bf16 %v367_v22, %v367_v22  ;;  %v625_v28 = vpop.f32.mrb[2].mxu1  ;;  %419 = vst.msk [vmem:[%s233_s24 + $0x4] sm:$0xf] %vm417_vm1, %v586_v23  ;;  %v362_v29 = vadd.f32 %v619_v27, %v562_v14  ;;  %v356_v31 = vpop.f32.mrb[3].mxu0 }
 0x150   : > { %423 = vst.msk [vmem:[%s233_s24 + $0x14] sm:$0xf] %vm417_vm1, %v590_v24  ;;  %v382_v30 = vadd.f32 %v625_v28, %v562_v14  ;;  %v376_v32 = vpop.f32.mrb[3].mxu1  ;;  %418 = vst.msk [vmem:[%s233_s24] sm:$0xf] %vm417_vm1, %v585_v25  ;;  %v357_v33 = vadd.f32 %v562_v14, %v356_v31 }
 0x151   : > { %422 = vst.msk [vmem:[%s233_s24 + $0x10] sm:$0xf] %vm417_vm1, %v589_v26  ;;  %v377_v34 = vadd.f32 %v562_v14, %v376_v32  ;;  %v588_v35 = vpack.c.bf16 %v362_v29, %v362_v29 }
 0x152   : > { %v592_v36 = vpack.c.bf16 %v382_v30, %v382_v30  ;;  %v587_v37 = vpack.c.bf16 %v357_v33, %v357_v33 }
 0x153   : > { %v591_v38 = vpack.c.bf16 %v377_v34, %v377_v34  ;;  %421 = vst.msk [vmem:[%s233_s24 + $0xc] sm:$0xf] %vm417_vm1, %v588_v35 }
 0x154   : > { %425 = vst.msk [vmem:[%s233_s24 + $0x1c] sm:$0xf] %vm417_vm1, %v592_v36  ;;  %420 = vst.msk [vmem:[%s233_s24 + $0x8] sm:$0xf] %vm417_vm1, %v587_v37 }
 0x155   : > { %424 = vst.msk [vmem:[%s233_s24 + $0x18] sm:$0xf] %vm417_vm1, %v591_v38 }
 0x156   : > { %824 = shalt.err (!%p821_p11)
}
 0x157   : > { %s825_s30 = scalar_lea.hbm %s1161_s26, 512  ;;  %s829_s7 = scalar_lea.hbm %s1219_s3, 1024 }
 0x158   : > { %p826_p0 = scmp.ne.s32.totalorder %s1161_s26, %s825_s30  ;;  %p830_p6 = scmp.lt.u32.totalorder %s1161_s26, %s1219_s3 }
 0x159   : > { %p831_p7 = scmp.lt.u32.totalorder %s829_s7, %s825_s30  ;;  %p833_p8 = scmp.lt.u32.totalorder %s825_s30, %s1161_s26 }
 0x15a   : > { %p827_p4 = pnand %p826_p0, %p1234_p12 }
 0x15b   : > { %p832_p2 = por %p831_p7, %p830_p6 }
 0x15c   : > { %p828_p13 = pneg %p827_p4 }
 0x15d   : > { %p834_p1 = por %p833_p8, %p832_p2 }
 0x15f   : > { %p835_p10 = pnand %p834_p1, %p828_p13 }
 0x161   : > { %838 = shalt.err (!%p835_p10)
}
 0x162   : > { %s905_s22 = smov 64   ;;  %s906_s24 = smov 4  }
 0x163   : > { %648 = dma.vmem_to_hbm [thread:$0]  (%p1234_p12), %s1163_s11, 512, %s1161_s26, %s427_s9, %s905_s22, %s905_s22, %s906_s24  }
 0x164 PF: > { %s457_s15 = sand.u32 1, %s877_s12   ;;  %p1235_p3 = scmp.ne.s32.totalorder %s1227_s23, 0 }
 0x165   : > { %p1236_p5 = scmp.ge.s32.totalorder %s897_s17, 2  ;;  %s458_s18 = scalar_lea.sflag [#allocation4], %s457_s15 }
 0x167   : > { %p662_p9 = pnand %p1236_p5, %p1235_p3 }
 0x169   : > { %872 = dma.done.wait (!%p662_p9), %s458_s18, 512  }
 0x16a   : > { %874 = vsyncadd (!%p662_p9), %s458_s18, 4294966784  ;;  %s20_s17 = sadd.s32 1, %s897_s17   ;;  %s1237_s12 = smov %s881_s13 }
 0x16b   : > { %p17_p11 = scmp.ge.s32.totalorder %s20_s17, 4   ;;  %s1238_s13 = smov %s885_s14 }
 0x16c   : > { %s1239_s14 = smov %s1073_s6  ;;  %s1240_s15 = smov %s893_s16 }
 0x16d   : > { %s1241_s16 = smov %s1243_s25  ;;  %19 = sbr.rel (!%p17_p11) target bundleno = 7 (0x7), region = 85 }
 0x174   :  { %463 = vsyncpa [#allocation3], 1 }
 0x175   :  { %465 = vsyncpa [#allocation3 + $0x1], 1 }
 0x176   :  { %466 = vsyncpa [#allocation6], 1 }
 0x177   :  { %467 = vsyncpa [#allocation4], 1 }
 0x178   :  { %469 = vsyncpa [#allocation4 + $0x1], 1 }

</bundles_post_ra>
